<compile_context>
chip_gen: v6e
topology: v6e:2x2x1
jax: 0.10.0
libtpu: 0.0.40
codegen_flags: <defaults>
</compile_context>

<pallas_src>
import functools
import math

import jax
import jax.numpy as jnp
from jax.experimental import pallas as pl
from jax.experimental.pallas import tpu as pltpu


def _round_up(x, m):
    return ((x + m - 1) // m) * m


def _unfold_nchw(x, k, stride, padding, dilation):
    """torch.nn.functional.unfold equivalent. Returns ([B, C*k*k, oH*oW], oH, oW)."""
    B, C, H, W = x.shape
    oH = (H + 2 * padding - dilation * (k - 1) - 1) // stride + 1
    oW = (W + 2 * padding - dilation * (k - 1) - 1) // stride + 1
    xp = jnp.pad(x, ((0, 0), (0, 0), (padding, padding), (padding, padding)))
    patches = []
    for i in range(k):
        for j in range(k):
            hs = i * dilation
            ws = j * dilation
            patch = xp[:, :,
                       hs:hs + (oH - 1) * stride + 1:stride,
                       ws:ws + (oW - 1) * stride + 1:stride]  # [B, C, oH, oW]
            patches.append(patch)
    cols = jnp.stack(patches, axis=2)  # [B, C, k*k, oH, oW]  (channel-major like torch)
    return cols.reshape(B, C * k * k, oH * oW), oH, oW


def _conv_square_kernel(x_ref, alpha_ref, w_ref, b_ref, o_ref, *, a, b, c, channels):
    # x_ref:     (1, C*KK, TP) bf16  input patches for one (batch, N-tile) block
    # alpha_ref: (1, KK,   TP) f32   alpha patches for the same block
    # w_ref:     (O, C*KK)     bf16  flattened conv weight (resident across grid)
    # b_ref:     (O, 1)        f32   bias column (resident across grid)
    # o_ref:     (1, O,    TP) f32   output tile
    alpha = alpha_ref[0]                                   # (KK, TP)  f32
    poly = (a * alpha + b) * alpha + c                     # a*x^2 + b*x + c  (VPU, f32)
    poly_c = jnp.tile(poly, (channels, 1))                 # (C*KK, TP): row r -> poly[r % KK]
    mod = (x_ref[0].astype(jnp.float32) * poly_c).astype(jnp.bfloat16)
    acc = jnp.dot(w_ref[...], mod, preferred_element_type=jnp.float32)   # (O, TP), MXU
    o_ref[0] = acc + b_ref[...]


def conv_square(inputs, alpha, weight, bias, a, b, c,
                stride=1, padding=0, dilation=1, tile_n=1024):
    B, C, H, W = inputs.shape
    O, Cw, kh, kw = weight.shape
    assert Cw == C and kh == kw
    k = kh
    KK = k * k
    CKK = C * KK

    x_cols, oH, oW = _unfold_nchw(inputs, k, stride, padding, dilation)   # [B, CKK, P]
    a_cols, _, _ = _unfold_nchw(alpha, k, stride, padding, dilation)      # [B, KK,  P]
    P = oH * oW

    # Lane-dense N tiles: TP multiple of 128, capped at tile_n, never larger than
    # the (rounded-up) spatial extent.  Grid = (batch, P tiles), both parallel.
    TP = min(_round_up(tile_n, 128), _round_up(P, 128))
    Ppad = _round_up(P, TP)
    n_tiles = Ppad // TP

    x_cols = jnp.pad(x_cols, ((0, 0), (0, 0), (0, Ppad - P))).astype(jnp.bfloat16)
    a_cols = jnp.pad(a_cols, ((0, 0), (0, 0), (0, Ppad - P))).astype(jnp.float32)
    w2 = weight.reshape(O, CKK).astype(jnp.bfloat16)   # contraction order (c, kh, kw) matches unfold
    b_col = bias.reshape(O, 1).astype(jnp.float32)

    kern = functools.partial(
        _conv_square_kernel, a=float(a), b=float(b), c=float(c), channels=C)

    out = pl.pallas_call(
        kern,
        out_shape=jax.ShapeDtypeStruct((B, O, Ppad), jnp.float32),
        grid_spec=pltpu.PrefetchScalarGridSpec(
            num_scalar_prefetch=0,
            grid=(B, n_tiles),
            in_specs=[
                pl.BlockSpec((1, CKK, TP), lambda bi, ni: (bi, 0, ni)),
                pl.BlockSpec((1, KK, TP), lambda bi, ni: (bi, 0, ni)),
                pl.BlockSpec((O, CKK), lambda bi, ni: (0, 0)),   # resident weight
                pl.BlockSpec((O, 1), lambda bi, ni: (0, 0)),     # resident bias
            ],
            out_specs=pl.BlockSpec((1, O, TP), lambda bi, ni: (bi, 0, ni)),
        ),
        compiler_params=pltpu.CompilerParams(
            dimension_semantics=("parallel", "parallel")),
    )(x_cols, a_cols, w2, b_col)

    return out[:, :, :P].reshape(B, O, oH, oW)


def conv_square_reference(inputs, alpha, weight, bias, a, b, c,
                          stride=1, padding=0, dilation=1):
    """Pure-JAX reference mirroring the torch forward math (f32)."""
    B, C, H, W = inputs.shape
    O, _, k, _ = weight.shape
    x_cols, oH, oW = _unfold_nchw(inputs, k, stride, padding, dilation)
    a_cols, _, _ = _unfold_nchw(alpha, k, stride, padding, dilation)
    x_wins = x_cols.reshape(B, C, k, k, oH, oW)
    a_wins = a_cols.reshape(B, 1, k, k, oH, oW)
    kernel = (a * a_wins + b) * a_wins + c
    x_mul = x_wins * kernel
    out = jnp.einsum('ijklmn,ojkl->iomn', x_mul, weight)
    return out + bias.reshape(1, -1, 1, 1)


if __name__ == "__main__":
    # Small shapes consistent with the module: batch=2, in_channels=4,
    # out_channels=8, spatial 16x16, kernel_size=3, padding=1 (same-size output).
    B, Cin, Cout, H, W, K = 2, 4, 8, 16, 16, 3
    stride, padding, dilation = 1, 1, 1

    key = jax.random.PRNGKey(0)
    k_in, k_al, k_w, k_b = jax.random.split(key, 4)

    inputs = jax.random.normal(k_in, (B, Cin, H, W), dtype=jnp.float32)
    alpha = jax.random.uniform(k_al, (B, 1, H, W), dtype=jnp.float32)

    # Deterministic parameter init mirroring reset_parameters():
    # kaiming_uniform_(a=sqrt(5)) -> U(-1/sqrt(fan_in), 1/sqrt(fan_in)); same bound for bias.
    fan_in = Cin * K * K
    bound = 1.0 / math.sqrt(fan_in)
    weight = jax.random.uniform(k_w, (Cout, Cin, K, K), dtype=jnp.float32,
                                minval=-bound, maxval=bound)
    bias = jax.random.uniform(k_b, (Cout,), dtype=jnp.float32,
                              minval=-bound, maxval=bound)
    a_s, b_s, c_s = -4.0, 4.0, 1.0   # default a, b, c from reset_parameters()

    out = conv_square(inputs, alpha, weight, bias, a_s, b_s, c_s,
                      stride=stride, padding=padding, dilation=dilation)
    out = jax.block_until_ready(out)

    ref = conv_square_reference(inputs, alpha, weight, bias, a_s, b_s, c_s,
                                stride=stride, padding=padding, dilation=dilation)
    assert out.shape == (B, Cout, H, W), out.shape
    max_err = float(jnp.max(jnp.abs(out - ref)))
    # bf16 matmul operands (f32 accumulation) vs f32 reference -> loosened tolerance.
    assert jnp.allclose(out, ref, rtol=2e-2, atol=2e-2), max_err

    print("KERNEL_OK")
</pallas_src>

<mosaic_0001>
module attributes {stable_mosaic.version = 11 : i64} {
  func.func @_conv_square_kernel(%arg0: i32, %arg1: i32, %arg2: memref<1x36x256xbf16, #tpu.memory_space<vmem>>, %arg3: memref<1x9x256xf32, #tpu.memory_space<vmem>>, %arg4: memref<8x36xbf16, #tpu.memory_space<vmem>>, %arg5: memref<8x1xf32, #tpu.memory_space<vmem>>, %arg6: memref<1x8x256xf32, #tpu.memory_space<vmem>>) attributes {dimension_semantics = [#tpu.dimension_semantics<parallel>, #tpu.dimension_semantics<parallel>], iteration_bounds = array<i64: 2, 1>, scalar_prefetch = 0 : i64, scratch_operands = 0 : i64, tpu.core_type = #tpu.core_type<tc>, window_params = [{transform_indices = @transform_0, window_bounds = array<i64: 1, 36, 256>}, {transform_indices = @transform_1, window_bounds = array<i64: 1, 9, 256>}, {pipeline_mode = #tpu.pipeline_mode<synchronous>, transform_indices = @transform_2, window_bounds = array<i64: 8, 36>}, {pipeline_mode = #tpu.pipeline_mode<synchronous>, transform_indices = @transform_3, window_bounds = array<i64: 8, 1>}, {transform_indices = @transform_4, window_bounds = array<i64: 1, 8, 256>}]} {
    %c0 = arith.constant 0 : index
    %c0_0 = arith.constant 0 : index
    %c0_1 = arith.constant 0 : index
    %0 = vector.load %arg3[%c0, %c0_0, %c0_1] : memref<1x9x256xf32, #tpu.memory_space<vmem>>, vector<1x9x256xf32>
    %1 = vector.shape_cast %0 : vector<1x9x256xf32> to vector<9x256xf32>
    %cst = arith.constant -4.000000e+00 : f32
    %2 = vector.broadcast %cst : f32 to vector<9x256xf32>
    %3 = arith.mulf %2, %1 : vector<9x256xf32>
    %cst_2 = arith.constant 4.000000e+00 : f32
    %4 = vector.broadcast %cst_2 : f32 to vector<9x256xf32>
    %5 = arith.addf %3, %4 : vector<9x256xf32>
    %6 = arith.mulf %5, %1 : vector<9x256xf32>
    %cst_3 = arith.constant 1.000000e+00 : f32
    %7 = vector.broadcast %cst_3 : f32 to vector<9x256xf32>
    %8 = arith.addf %6, %7 : vector<9x256xf32>
    %9 = tpu.concatenate %8, %8, %8, %8 in 0 : vector<9x256xf32>, vector<9x256xf32>, vector<9x256xf32>, vector<9x256xf32> -> vector<36x256xf32>
    %c0_4 = arith.constant 0 : index
    %c0_5 = arith.constant 0 : index
    %c0_6 = arith.constant 0 : index
    %10 = vector.load %arg2[%c0_4, %c0_5, %c0_6] : memref<1x36x256xbf16, #tpu.memory_space<vmem>>, vector<1x36x256xbf16>
    %11 = vector.shape_cast %10 : vector<1x36x256xbf16> to vector<36x256xbf16>
    %12 = arith.extf %11 : vector<36x256xbf16> to vector<36x256xf32>
    %13 = arith.mulf %12, %9 : vector<36x256xf32>
    %14 = arith.truncf %13 : vector<36x256xf32> to vector<36x256xbf16>
    %c0_7 = arith.constant 0 : index
    %c0_8 = arith.constant 0 : index
    %15 = vector.load %arg4[%c0_7, %c0_8] : memref<8x36xbf16, #tpu.memory_space<vmem>>, vector<8x36xbf16>
    %cst_9 = arith.constant dense<0.000000e+00> : vector<8x256xf32>
    %16 = tpu.matmul %15, %14, %cst_9 {dimension_numbers = #tpu.dot_dimension_numbers<[1], [0], [0], [1], [0, 0, 1, 1], [], []>} : vector<8x36xbf16>, vector<36x256xbf16>, vector<8x256xf32> -> vector<8x256xf32>
    %c0_10 = arith.constant 0 : index
    %c0_11 = arith.constant 0 : index
    %17 = vector.load %arg5[%c0_10, %c0_11] : memref<8x1xf32, #tpu.memory_space<vmem>>, vector<8x1xf32>
    %18 = vector.broadcast %17 : vector<8x1xf32> to vector<8x256xf32>
    %19 = arith.addf %16, %18 : vector<8x256xf32>
    %c0_12 = arith.constant 0 : index
    %c0_13 = arith.constant 0 : index
    %c0_14 = arith.constant 0 : index
    %20 = vector.load %arg6[%c0_12, %c0_13, %c0_14] : memref<1x8x256xf32, #tpu.memory_space<vmem>>, vector<1x8x256xf32>
    %21 = vector.shape_cast %20 : vector<1x8x256xf32> to vector<8x256xf32>
    %22 = vector.shape_cast %19 : vector<8x256xf32> to vector<1x8x256xf32>
    tpu.vector_store %arg6[%c0_12, %c0_13, %c0_14], %22 {strides = array<i32>} : memref<1x8x256xf32, #tpu.memory_space<vmem>>, vector<1x8x256xf32>,
    return
  }
  func.func @transform_0(%arg0: i32, %arg1: i32) -> (i32, i32, i32) {
    %c0_i32 = arith.constant 0 : i32
    %c0_i32_0 = arith.constant 0 : i32
    return %arg0, %c0_i32, %arg1 : i32, i32, i32
  }
  func.func @transform_1(%arg0: i32, %arg1: i32) -> (i32, i32, i32) {
    %c0_i32 = arith.constant 0 : i32
    %c0_i32_0 = arith.constant 0 : i32
    return %arg0, %c0_i32, %arg1 : i32, i32, i32
  }
  func.func @transform_2(%arg0: i32, %arg1: i32) -> (i32, i32) {
    %c0_i32 = arith.constant 0 : i32
    %c0_i32_0 = arith.constant 0 : i32
    %c0_i32_1 = arith.constant 0 : i32
    return %c0_i32, %c0_i32_0 : i32, i32
  }
  func.func @transform_3(%arg0: i32, %arg1: i32) -> (i32, i32) {
    %c0_i32 = arith.constant 0 : i32
    %c0_i32_0 = arith.constant 0 : i32
    %c0_i32_1 = arith.constant 0 : i32
    return %c0_i32, %c0_i32_0 : i32, i32
  }
  func.func @transform_4(%arg0: i32, %arg1: i32) -> (i32, i32, i32) {
    %c0_i32 = arith.constant 0 : i32
    %c0_i32_0 = arith.constant 0 : i32
    return %arg0, %c0_i32, %arg1 : i32, i32, i32
  }
}

</mosaic_0001>

<bundles_post_ra>
// kernel: tpu_custom_call.1
= control target key start
LH: loop header
LB: loop body
LE: loop exit
PB: predicated region body
PF: predicated region fallthrough
CT: control target
= control target key end

     0   :  { %9 = vsyncpa [#allocation3], 0  ;;  %s852_s0 = inlined_call_operand.vmem [shape: bf16[2,36,256], index: 0, kind: input, shape index: {}]   ;;  %s853_s1 = inlined_call_operand.vmem [shape: f32[2,9,256], index: 1, kind: input, shape index: {}]   ;;  %s854_s2 = inlined_call_operand.vmem [shape: bf16[8,36], index: 2, kind: input, shape index: {}]   ;;  %s855_s3 = inlined_call_operand.vmem [shape: f32[8,1], index: 3, kind: input, shape index: {}]   ;;  %s856_s4 = inlined_call_operand.hbm [shape: f32[2,8,256], index: 4, kind: output, shape index: {}]  }
   0x1   :  { %11 = vsyncpa [#allocation3 + $0x1], 0  ;;  %s710_s15 = smov 0   ;;  %s712_s16 = smov 0  }
   0x2   :  { %s714_s17 = smov 0   ;;  %s716_s18 = smov 0  }
   0x3   :  { %s718_s19 = smov 0   ;;  %s720_s20 = smov 0  }
   0x4 LB: > { %s529_s21 = sadd.s32 4294967295, %s681_s20   ;;  %s530_s22 = sadd.s32 4294967294, %s681_s20   ;;  %s681_s20 = sphi %s720_s20, %s17_s20   ;;  %s677_s19 = sphi %s718_s19, %s863_s19   ;;  %s673_s18 = sphi %s716_s18, %s862_s18   ;;  %s669_s17 = sphi %s714_s17, %s861_s17   ;;  %s665_s16 = sphi %s712_s16, %s860_s16   ;;  %s661_s15 = sphi %s710_s15, %s859_s15  }
   0x5   : > { %s29_s23 = sadd.s32 1, %s677_s19  ;;  %s136_s24 = sadd.s32 1, %s669_s17 }
   0x6   : > { %p31_p0 = scmp.ge.s32.totalorder %s29_s23, 2  ;;  %p146_p1 = scmp.ne.s32.totalorder %s669_s17, %s665_s16 }
   0x7   : > { %p147_p2 = scmp.eq.s32.totalorder %s529_s21, 1  ;;  %p152_p3 = scmp.ne.s32.totalorder %s665_s16, %s661_s15 }
   0x8   : > { %s865_s23 = smov (%p31_p0, %s29_s23), 0  ;;  %p153_p5 = scmp.eq.s32.totalorder %s530_s22, 1 }
   0x9   : > { %p750_p4 = por %p147_p2, %p146_p1  ;;  %s131_s26 = ssub.s32 %s677_s19, %s865_s23 }
   0xa   : > { %p533_p6 = scmp.ge.s32.totalorder %s681_s20, 1  ;;  %p134_p7 = scmp.eq.s32.totalorder %s131_s26, 0 }
   0xb   : > { %p757_p8 = por %p153_p5, %p152_p3  ;;  %p203_p9 = scmp.lt.s32.totalorder %s681_s20, 3 }
   0xc   : > { %s763_s28 = scalar_select %p134_p7, %s669_s17, %s136_s24  }
   0xd   : > { %p204_p10 = pnand %p533_p6, %p203_p9 }
   0xe   : > { %p243_p11 = scmp.lt.s32.totalorder (!%p204_p10), %s673_s18, 1  ;;  %s239_s22 = sand.u32 (!%p204_p10), 1, %s665_s16  }
   0xf   : > { %207 = sbr.rel (%p204_p10) target bundleno = 264 (0x108), region = 36  ;;  %s534_s24 = sshll.u32 (!%p204_p10), %s239_s22, 4 }
  0x10   : > { %s546_s26 = sshll.u32 (!%p204_p10), %s673_s18, 8  ;;  %s241_s29 = scalar_lea.vmem (!%p204_p10), [#allocation2], %s534_s24 }
  0x11   : > { %s435_s30 = sshll.u32 (!%p204_p10), %s241_s29, 4  ;;  %s684_s9 = smov (!%p204_p10), [#allocation2]   ;;  %s808_s30 = int_to_ptr.vmem [resolvable:$true] %s435_s30 }
  0x12   : > { %s605_s8 = scalar_lea.vmem (!%p204_p10), %s808_s30, 256 }
  0x13   : > { %p606_p12 = scmp.ne.s32.totalorder (!%p204_p10), %s808_s30, %s605_s8 }
  0x14   : > { %v359_v0 = vld [vmem:[%s855_s3] sm:$0xff]  ;;  %v683_v1 = vmov 0   ;;  %s244_s5 = scalar_select %p243_p11, %s673_s18, 1  ;;  %vm299_vm0 = vcmask 1041408   ;;  %vm310_vm1 = vcmask 1042432   ;;  %vm288_vm2 = vcmask 1040384  }
  0x15   : > { %407 = vmatprep.mubr.bf16.mxu0 %v683_v1  ;;  %604 = vset.pattern.permute.xlu0 %v683_v1  ;;  %vm365_vm3 = vcmask 293888   ;;  %s419_s18 = scalar_lea.sflag [#allocation3], %s239_s22  ;;  %p607_p13 = pnand %p606_p12, %p750_p4 }
  0x16   : > { %362 = vperm.xlu0 %604, %v359_v0   ;;  %s547_s6 = smul.u32 40, %s244_s5  ;;  %s545_s7 = sshll.u32 %s244_s5, 5 }
  0x17   : > { %s260_s10 = scalar_lea.vmem %s853_s1, %s545_s7  ;;  %s806_s7 = scalar_lea.hbm %s856_s4, %s546_s26 }
  0x18   : > { %s250_s13 = scalar_lea.vmem %s852_s0, %s547_s6  ;;  %v265_v2 = vld [vmem:[%s260_s10 + $0x8] sm:$0xff]  ;;  %v267_v3 = vld [vmem:[%s260_s10 + $0x18] sm:$0x1]  ;;  %v264_v4 = vld [vmem:[%s260_s10] sm:$0xff]  ;;  %p608_p0 = pneg %p607_p13 }
  0x19   : > { %v269_v5 = vmul.f32 -4.0, %v265_v2  ;;  %v271_v6 = vmul.f32 -4.0, %v267_v3  ;;  %v331_v7 = vld [vmem:[%s250_s13 + $0x20] sm:$0x33]  ;;  %v266_v8 = vld [vmem:[%s260_s10 + $0x10] sm:$0x1] }
  0x1a   : > { %v268_v9 = vmul.f32 -4.0, %v264_v4  ;;  %v270_v10 = vmul.f32 -4.0, %v266_v8  ;;  %v776_v11 = vld [vmem:[%s250_s13 + $0x10] sm:$0xff]  ;;  %v778_v12 = vld [vmem:[%s250_s13 + $0x18] sm:$0xff]  ;;  %v341_v15 = vunpack.c.h.bf16 %v331_v7  ;;  %v340_v18 = vunpack.c.l.bf16 %v331_v7  ;;  %v327_v19 = vld [vmem:[%s250_s13] sm:$0xff]  ;;  %s609_s10 = sshll.u32 %s684_s9, 4  ;;  %s610_s10 = int_to_ptr.vmem [resolvable:$false] %s609_s10 }
  0x1b   : > { %v273_v13 = vadd.f32 4.0, %v269_v5  ;;  %v275_v14 = vadd.f32 4.0, %v271_v6  ;;  %v328_v20 = vld [vmem:[%s250_s13 + $0x8] sm:$0xff]  ;;  %v337_v23 = vunpack.c.h.bf16 %v776_v11  ;;  %v339_v24 = vunpack.c.h.bf16 %v778_v12  ;;  %s611_s11 = scalar_lea.vmem %s610_s10, 512  ;;  %p612_p1 = scmp.lt.s32.totalorder %s808_s30, %s610_s10 }
  0x1c   : > { %v272_v16 = vadd.f32 4.0, %v268_v9  ;;  %v274_v17 = vadd.f32 4.0, %v270_v10  ;;  %v336_v27 = vunpack.c.l.bf16 %v776_v11  ;;  %v338_v28 = vunpack.c.l.bf16 %v778_v12  ;;  %p613_p2 = scmp.lt.s32.totalorder %s611_s11, %s605_s8 }
  0x1d   : > { %v277_v21 = vmul.f32 %v273_v13, %v265_v2  ;;  %v279_v22 = vmul.f32 %v275_v14, %v267_v3  ;;  %v333_v31 = vunpack.c.h.bf16 %v327_v19  ;;  %v335_v32 = vunpack.c.h.bf16 %v328_v20  ;;  %v358_v14 = vld [vmem:[%s854_s2] sm:$0xf] }
  0x1e   : > { %v276_v25 = vmul.f32 %v272_v16, %v264_v4  ;;  %v278_v26 = vmul.f32 %v274_v17, %v266_v8  ;;  %v332_v35 = vunpack.c.l.bf16 %v327_v19  ;;  %v334_v36 = vunpack.c.l.bf16 %v328_v20  ;;  %p614_p3 = por %p613_p2, %p612_p1 }
  0x1f   : > { %v281_v29 = vadd.f32 1.0, %v277_v21  ;;  %v283_v30 = vadd.f32 1.0, %v279_v22 }
  0x20   : > { %v280_v33 = vadd.f32 1.0, %v276_v25  ;;  %v282_v34 = vadd.f32 1.0, %v278_v26  ;;  %p615_p5 = pnand %p614_p3, %p608_p0 }
  0x21   : > { %v312_v37 = vrot.slane %v281_v29, 5  ;;  %v315_v38 = vrot.slane %v283_v30, 5  ;;  %v290_v39 = vrot.slane %v281_v29, 7  ;;  %v293_v40 = vrot.slane %v283_v30, 7 }
  0x22   : > { %v311_v41 = vrot.slane %v280_v33, 5  ;;  %v313_v42 = vrot.slane %v282_v34, 5  ;;  %v301_v43 = vrot.slane %v281_v29, 6  ;;  %v304_v44 = vrot.slane %v283_v30, 6 }
  0x23   : > { %v316_v45 = vsel %vm310_vm1, %v312_v37, %v315_v38  ;;  %v294_v46 = vsel %vm288_vm2, %v290_v39, %v293_v40  ;;  %v289_v47 = vrot.slane %v280_v33, 7  ;;  %v291_v48 = vrot.slane %v282_v34, 7 }
  0x24   : > { %v351_v49 = vmul.f32 %v341_v15, %v316_v45  ;;  %v314_v50 = vsel %vm310_vm1, %v311_v41, %v313_v42  ;;  %v305_v51 = vsel %vm299_vm0, %v301_v43, %v304_v44  ;;  %v324_v52 = vsel %vm299_vm0, %v294_v46, %v301_v43 }
  0x25   : > { %v350_v53 = vmul.f32 %v340_v18, %v314_v50  ;;  %v326_v54 = vsel %vm310_vm1, %v305_v51, %v312_v37  ;;  %v347_v55 = vmul.f32 %v337_v23, %v324_v52  ;;  %v292_v56 = vsel %vm288_vm2, %v289_v47, %v291_v48 }
  0x26   : > { %v357_v57 = vpack.c.bf16 %v351_v49, %v351_v49  ;;  %v349_v58 = vmul.f32 %v339_v24, %v326_v54  ;;  %v300_v59 = vrot.slane %v280_v33, 6  ;;  %v302_v60 = vrot.slane %v282_v34, 6 }
  0x27   : > { %v356_v61 = vpack.c.bf16 %v350_v53, %v350_v53  ;;  %v322_v62 = vsel %vm288_vm2, %v283_v30, %v290_v39  ;;  %v343_v63 = vmul.f32 %v333_v31, %v281_v29  ;;  %v321_v0 = vsel %vm288_vm2, %v282_v34, %v289_v47 }
  0x28   : > { %538 = vmatprep.subr.msk.bf16.mxu0 %vm299_vm0, %v357_v57  ;;  %v355_v1 = vpack.c.bf16 %v349_v58, %v347_v55  ;;  %v303_v2 = vsel %vm299_vm0, %v300_v59, %v302_v60  ;;  %v323_v3 = vsel %vm299_vm0, %v292_v56, %v300_v59  ;;  %v345_v4 = vmul.f32 %v335_v32, %v322_v62 }
  0x29   : > { %v370_v5 = vsel %vm299_vm0, %v356_v61, 0  ;;  %v325_v6 = vsel %vm310_vm1, %v303_v2, %v311_v41  ;;  %v346_v7 = vmul.f32 %v336_v27, %v323_v3  ;;  %v342_v9 = vmul.f32 %v332_v35, %v280_v33 }
  0x2a   : > { %386 = vmatpush1.bf16.msra.mxu0 %v370_v5  ;;  %v348_v8 = vmul.f32 %v338_v28, %v325_v6  ;;  %v344_v10 = vmul.f32 %v334_v36, %v321_v0  ;;  %v353_v11 = vpack.c.bf16 %v345_v4, %v343_v63 }
  0x2b   : > { %387 = vmatprep.subr.bf16.mxu0 %v355_v1 }
  0x2c   : > { %v354_v12 = vpack.c.bf16 %v348_v8, %v346_v7  ;;  %v352_v13 = vpack.c.bf16 %v344_v10, %v342_v9 }
  0x2e   : > { %388 = vmatpush1.bf16.msra.mxu0 %v354_v12 }
  0x2f   : > { %389 = vmatprep.subr.bf16.mxu0 %v353_v11 }
  0x32   : > { %390 = vmatpush1.bf16.msra.mxu0 %v352_v13 }
  0x35   : > { %539 = vmatmul.mubr.msk.bf16.vlgmr.msra.gmra.mxu0 %vm365_vm3, %v358_v14 }
  0x91   : > { %v363_v15 = vpop.permute.xlu0 %362 }
  0xf5   : > { %v409_v16 = vpop.f32.mrf.mxu0 }
  0xf6   : > { %v410_v17 = vadd.f32 %v409_v16, %v363_v15 }
  0xf7   : > { %v411_v18 = vpop.f32.mrf.mxu0 }
  0xf8   : > { %416 = vst [vmem:[%s241_s29] sm:$0xff] %v410_v17  ;;  %v412_v19 = vadd.f32 %v411_v18, %v363_v15 }
  0xf9   : > { %v413_v20 = vpop.f32.mrf.mxu0 }
  0xfa   : > { %417 = vst [vmem:[%s241_s29 + $0x8] sm:$0xff] %v412_v19 }
  0xfb   : > { %v414_v21 = vpop.f32.mrf.mxu0 }
  0xfc   : > { %618 = shalt.err (!%p615_p5)
}
  0xfd   : > { %s619_s12 = scalar_lea.hbm %s806_s7, 256  ;;  %s623_s21 = scalar_lea.hbm %s856_s4, 512 }
  0xfe   : > { %p620_p6 = scmp.ne.s32.totalorder %s806_s7, %s619_s12  ;;  %p624_p10 = scmp.lt.s32.totalorder %s806_s7, %s856_s4 }
  0xff   : > { %p625_p11 = scmp.lt.s32.totalorder %s623_s21, %s619_s12 }
 0x100   : > { %p621_p7 = pnand %p620_p6, %p750_p4 }
 0x101   : > { %p626_p12 = por %p625_p11, %p624_p10 }
 0x102   : > { %p622_p9 = pneg %p621_p7 }
 0x104   : > { %p627_p13 = pnand %p626_p12, %p622_p9 }
 0x106   : > { %630 = shalt.err (!%p627_p13)
}
 0x107   : > { %548 = dma.vmem_to_hbm [thread:$0]  (%p750_p4), %s808_s30, 256, %s806_s7, %s419_s18  }
 0x108 PF: > { %p554_p0 = scmp.ge.s32.totalorder %s681_s20, 2  ;;  %s447_s26 = sand.u32 1, %s661_s15  }
 0x109   : > { %s448_s29 = scalar_lea.sflag [#allocation3], %s447_s26 }
 0x10a   : > { %p551_p1 = pnand %p554_p0, %p757_p8 }
 0x10c   : > { %p552_p2 = pneg %p551_p1 }
 0x10e   : > { %656 = dma.done.wait (%p552_p2), %s448_s29, 256  }
 0x10f   : > { %658 = vsyncadd (%p552_p2), %s448_s29, 4294967040  ;;  %s17_s20 = sadd.s32 1, %s681_s20   ;;  %s859_s15 = smov %s665_s16 }
 0x110   : > { %p14_p3 = scmp.ge.s32.totalorder %s17_s20, 4   ;;  %s860_s16 = smov %s669_s17 }
 0x111   : > { %s861_s17 = smov %s763_s28  ;;  %s862_s18 = smov %s677_s19 }
 0x112   : > { %s863_s19 = smov %s865_s23  ;;  %16 = sbr.rel (!%p14_p3) target bundleno = 4 (0x4), region = 74 }
 0x117   :  { %453 = vsyncpa [#allocation3], 1 }
 0x118   :  { %455 = vsyncpa [#allocation3 + $0x1], 1 }

</bundles_post_ra>
